<compile_context>
chip_gen: v7x
topology: tpu7x:2x2x1
jax: 0.10.0
libtpu: 0.0.40
codegen_flags: <defaults>
</compile_context>

<pallas_src>
import jax
import jax.numpy as jnp
from jax.experimental import pallas as pl
from jax.experimental.pallas import tpu as pltpu


def _round_up(n, m):
    return ((n + m - 1) // m) * m


def _pad_to(a, shape):
    pads = [(0, t - s) for s, t in zip(a.shape, shape)]
    if any(p[1] for p in pads):
        a = jnp.pad(a, pads)
    return a


def mlp_kernel(x_ref, w1_ref, b1_ref, w2_ref, b2_ref, w3_ref, b3_ref, o_ref):
    # x_ref: (bm, Dp) bf16; weights W1/W2 bf16; biases + W3 row in f32.
    x = x_ref[...]

    # Layer 1: MXU matmul (bf16 operands, f32 accumulate), bias + ReLU on VPU.
    h1 = jnp.dot(x, w1_ref[...], preferred_element_type=jnp.float32)
    h1 = jnp.maximum(h1 + b1_ref[...], 0.0)                      # (bm, H1p) f32

    # Layer 2: MXU matmul, bias + ReLU on VPU.
    h2 = jnp.dot(h1.astype(w2_ref.dtype), w2_ref[...],
                 preferred_element_type=jnp.float32)
    h2 = jnp.maximum(h2 + b2_ref[...], 0.0)                      # (bm, H2p) f32

    # Layer 3 (output dim = 1): avoid a <1%-utilisation N=1 MXU pass.
    # VPU multiply + lane reduction, result written lane-dense as (1, bm).
    logits = jnp.sum(h2 * w3_ref[...], axis=-1)[None, :] + b3_ref[...]
    o_ref[...] = logits.astype(o_ref.dtype)                      # (1, bm)


def mlp_forward(x, w1, b1, w2, b2, w3, b3, *, block_m=256,
                mxu_dtype=jnp.bfloat16):
    """x: (B, D). Weights are (in, out); biases are (1, out). Returns (B, 1) f32."""
    B, D = x.shape
    H1 = w1.shape[1]
    H2 = w2.shape[1]

    # Lane-align feature dims (zero pad is exact under matmul + ReLU).
    Dp = _round_up(D, 128)
    H1p = _round_up(H1, 128)
    H2p = _round_up(H2, 128)

    # Batch tiling: collapse to one grid step when the batch is small, else
    # block_m-row tiles (multiple of 16 for bf16 sublane packing).
    block_m = _round_up(block_m, 16)
    bm = min(block_m, _round_up(B, 16))
    Bp = _round_up(B, bm)
    num_tiles = Bp // bm

    # Host-side padding / casts (done once outside the kernel).
    xp = _pad_to(x, (Bp, Dp)).astype(mxu_dtype)
    w1p = _pad_to(w1, (Dp, H1p)).astype(mxu_dtype)
    w2p = _pad_to(w2, (H1p, H2p)).astype(mxu_dtype)
    b1p = _pad_to(b1.reshape(1, H1), (1, H1p)).astype(jnp.float32)
    b2p = _pad_to(b2.reshape(1, H2), (1, H2p)).astype(jnp.float32)
    w3p = _pad_to(w3.reshape(H2, 1).T, (1, H2p)).astype(jnp.float32)  # (1, H2p)
    b3p = b3.reshape(1, 1).astype(jnp.float32)

    flops = 2 * Bp * (Dp * H1p + H1p * H2p + H2p)
    bytes_accessed = (sum(int(a.nbytes) for a in
                          (xp, w1p, b1p, w2p, b2p, w3p, b3p)) + Bp * 4)

    out = pl.pallas_call(
        mlp_kernel,
        out_shape=jax.ShapeDtypeStruct((1, Bp), jnp.float32),
        grid=(num_tiles,),
        in_specs=[
            pl.BlockSpec((bm, Dp), lambda i: (i, 0)),     # x tile
            pl.BlockSpec((Dp, H1p), lambda i: (0, 0)),    # W1 (resident)
            pl.BlockSpec((1, H1p), lambda i: (0, 0)),     # b1
            pl.BlockSpec((H1p, H2p), lambda i: (0, 0)),   # W2 (resident)
            pl.BlockSpec((1, H2p), lambda i: (0, 0)),     # b2
            pl.BlockSpec((1, H2p), lambda i: (0, 0)),     # W3 row
            pl.BlockSpec((1, 1), lambda i: (0, 0)),       # b3
        ],
        out_specs=pl.BlockSpec((1, bm), lambda i: (0, i)),  # lane-dense output
        compiler_params=pltpu.CompilerParams(
            dimension_semantics=("parallel",),
        ),
        cost_estimate=pl.CostEstimate(
            flops=flops, transcendentals=0, bytes_accessed=bytes_accessed),
    )(xp, w1p, b1p, w2p, b2p, w3p, b3p)

    # Back to (B, 1) column, dropping batch padding.
    return out[0, :B, None]


def init_linear(key, in_features, out_features, dtype=jnp.float32):
    """Deterministic init mimicking PyTorch's default U(-1/sqrt(in), 1/sqrt(in)).
    Returns W as (in, out) and b as (1, out)."""
    kw, kb = jax.random.split(key)
    bound = 1.0 / jnp.sqrt(jnp.asarray(in_features, dtype))
    w = jax.random.uniform(kw, (in_features, out_features), dtype, -bound, bound)
    b = jax.random.uniform(kb, (1, out_features), dtype, -bound, bound)
    return w, b


if __name__ == "__main__":
    # Small shapes consistent with the module: fingerprint dim 512, batch 16.
    input_dim, hidden_dim1, hidden_dim2 = 512, 256, 264
    batch = 16

    key = jax.random.PRNGKey(0)
    kx, k1, k2, k3 = jax.random.split(key, 4)

    x = jax.random.normal(kx, (batch, input_dim), jnp.float32)
    w1, b1 = init_linear(k1, input_dim, hidden_dim1)
    w2, b2 = init_linear(k2, hidden_dim1, hidden_dim2)
    w3, b3 = init_linear(k3, hidden_dim2, 1)

    out = mlp_forward(x, w1, b1, w2, b2, w3, b3)
    out = jax.block_until_ready(out)
    assert out.shape == (batch, 1), out.shape

    # Reference 1: mirrors the kernel's bf16-operand / f32-accumulate matmuls.
    xb = x.astype(jnp.bfloat16)
    w1b = w1.astype(jnp.bfloat16)
    w2b = w2.astype(jnp.bfloat16)
    h1 = jnp.maximum(
        jnp.dot(xb, w1b, preferred_element_type=jnp.float32) + b1, 0.0)
    h2 = jnp.maximum(
        jnp.dot(h1.astype(jnp.bfloat16), w2b,
                preferred_element_type=jnp.float32) + b2, 0.0)
    ref_bf16 = h2 @ w3 + b3
    err = float(jnp.max(jnp.abs(out - ref_bf16)))
    assert jnp.allclose(out, ref_bf16, atol=5e-3, rtol=5e-3), err

    # Reference 2: full-f32 PyTorch semantics (looser tolerance for bf16 MXU feed).
    h1f = jnp.maximum(x @ w1 + b1, 0.0)
    h2f = jnp.maximum(h1f @ w2 + b2, 0.0)
    ref_f32 = h2f @ w3 + b3
    err32 = float(jnp.max(jnp.abs(out - ref_f32)))
    assert jnp.allclose(out, ref_f32, atol=5e-2, rtol=5e-2), err32

    print("KERNEL_OK")
</pallas_src>

<mosaic_0001>
module attributes {stable_mosaic.version = 11 : i64} {
  func.func @mlp_kernel(%arg0: i32, %arg1: memref<16x512xbf16, #tpu.memory_space<vmem>>, %arg2: memref<512x256xbf16, #tpu.memory_space<vmem>>, %arg3: memref<1x256xf32, #tpu.memory_space<vmem>>, %arg4: memref<256x384xbf16, #tpu.memory_space<vmem>>, %arg5: memref<1x384xf32, #tpu.memory_space<vmem>>, %arg6: memref<1x384xf32, #tpu.memory_space<vmem>>, %arg7: memref<1x1xf32, #tpu.memory_space<vmem>>, %arg8: memref<1x16xf32, #tpu.memory_space<vmem>>) attributes {dimension_semantics = [#tpu.dimension_semantics<parallel>], iteration_bounds = array<i64: 1>, scalar_prefetch = 0 : i64, scratch_operands = 0 : i64, tpu.core_type = #tpu.core_type<tc>, window_params = [{transform_indices = @transform_0, window_bounds = array<i64: 16, 512>}, {pipeline_mode = #tpu.pipeline_mode<synchronous>, transform_indices = @transform_1, window_bounds = array<i64: 512, 256>}, {pipeline_mode = #tpu.pipeline_mode<synchronous>, transform_indices = @transform_2, window_bounds = array<i64: 1, 256>}, {pipeline_mode = #tpu.pipeline_mode<synchronous>, transform_indices = @transform_3, window_bounds = array<i64: 256, 384>}, {pipeline_mode = #tpu.pipeline_mode<synchronous>, transform_indices = @transform_4, window_bounds = array<i64: 1, 384>}, {pipeline_mode = #tpu.pipeline_mode<synchronous>, transform_indices = @transform_5, window_bounds = array<i64: 1, 384>}, {pipeline_mode = #tpu.pipeline_mode<synchronous>, transform_indices = @transform_6, window_bounds = array<i64: 1, 1>}, {transform_indices = @transform_7, window_bounds = array<i64: 1, 16>}]} {
    %c0 = arith.constant 0 : index
    %c0_0 = arith.constant 0 : index
    %0 = vector.load %arg1[%c0, %c0_0] : memref<16x512xbf16, #tpu.memory_space<vmem>>, vector<16x512xbf16>
    %c0_1 = arith.constant 0 : index
    %c0_2 = arith.constant 0 : index
    %1 = vector.load %arg2[%c0_1, %c0_2] : memref<512x256xbf16, #tpu.memory_space<vmem>>, vector<512x256xbf16>
    %cst = arith.constant dense<0.000000e+00> : vector<16x256xf32>
    %2 = tpu.matmul %0, %1, %cst {dimension_numbers = #tpu.dot_dimension_numbers<[1], [0], [0], [1], [0, 0, 1, 1], [], []>} : vector<16x512xbf16>, vector<512x256xbf16>, vector<16x256xf32> -> vector<16x256xf32>
    %c0_3 = arith.constant 0 : index
    %c0_4 = arith.constant 0 : index
    %3 = vector.load %arg3[%c0_3, %c0_4] : memref<1x256xf32, #tpu.memory_space<vmem>>, vector<1x256xf32>
    %4 = vector.broadcast %3 : vector<1x256xf32> to vector<16x256xf32>
    %5 = arith.addf %2, %4 : vector<16x256xf32>
    %cst_5 = arith.constant 0.000000e+00 : f32
    %6 = vector.broadcast %cst_5 : f32 to vector<16x256xf32>
    %7 = arith.maximumf %5, %6 : vector<16x256xf32>
    %8 = arith.truncf %7 : vector<16x256xf32> to vector<16x256xbf16>
    %c0_6 = arith.constant 0 : index
    %c0_7 = arith.constant 0 : index
    %9 = vector.load %arg4[%c0_6, %c0_7] : memref<256x384xbf16, #tpu.memory_space<vmem>>, vector<256x384xbf16>
    %cst_8 = arith.constant dense<0.000000e+00> : vector<16x384xf32>
    %10 = tpu.matmul %8, %9, %cst_8 {dimension_numbers = #tpu.dot_dimension_numbers<[1], [0], [0], [1], [0, 0, 1, 1], [], []>} : vector<16x256xbf16>, vector<256x384xbf16>, vector<16x384xf32> -> vector<16x384xf32>
    %c0_9 = arith.constant 0 : index
    %c0_10 = arith.constant 0 : index
    %11 = vector.load %arg5[%c0_9, %c0_10] : memref<1x384xf32, #tpu.memory_space<vmem>>, vector<1x384xf32>
    %12 = vector.broadcast %11 : vector<1x384xf32> to vector<16x384xf32>
    %13 = arith.addf %10, %12 : vector<16x384xf32>
    %cst_11 = arith.constant 0.000000e+00 : f32
    %14 = vector.broadcast %cst_11 : f32 to vector<16x384xf32>
    %15 = arith.maximumf %13, %14 : vector<16x384xf32>
    %c0_12 = arith.constant 0 : index
    %c0_13 = arith.constant 0 : index
    %16 = vector.load %arg6[%c0_12, %c0_13] : memref<1x384xf32, #tpu.memory_space<vmem>>, vector<1x384xf32>
    %17 = vector.broadcast %16 : vector<1x384xf32> to vector<16x384xf32>
    %18 = arith.mulf %15, %17 : vector<16x384xf32>
    %cst_14 = arith.constant dense<0.000000e+00> : vector<16xf32>
    %19 = vector.multi_reduction <add>, %18, %cst_14 [1] : vector<16x384xf32> to vector<16xf32>
    %20 = vector.shape_cast %19 : vector<16xf32> to vector<1x16xf32>
    %c0_15 = arith.constant 0 : index
    %c0_16 = arith.constant 0 : index
    %21 = vector.load %arg7[%c0_15, %c0_16] : memref<1x1xf32, #tpu.memory_space<vmem>>, vector<1x1xf32>
    %22 = vector.broadcast %21 : vector<1x1xf32> to vector<1x16xf32>
    %23 = arith.addf %20, %22 : vector<1x16xf32>
    %c0_17 = arith.constant 0 : index
    %c0_18 = arith.constant 0 : index
    %24 = vector.load %arg8[%c0_17, %c0_18] : memref<1x16xf32, #tpu.memory_space<vmem>>, vector<1x16xf32>
    tpu.vector_store %arg8[%c0_17, %c0_18], %23 {strides = array<i32>} : memref<1x16xf32, #tpu.memory_space<vmem>>, vector<1x16xf32>,
    return
  }
  func.func @transform_0(%arg0: i32) -> (i32, i32) {
    %c0_i32 = arith.constant 0 : i32
    %c0_i32_0 = arith.constant 0 : i32
    return %arg0, %c0_i32 : i32, i32
  }
  func.func @transform_1(%arg0: i32) -> (i32, i32) {
    %c0_i32 = arith.constant 0 : i32
    %c0_i32_0 = arith.constant 0 : i32
    %c0_i32_1 = arith.constant 0 : i32
    return %c0_i32, %c0_i32_0 : i32, i32
  }
  func.func @transform_2(%arg0: i32) -> (i32, i32) {
    %c0_i32 = arith.constant 0 : i32
    %c0_i32_0 = arith.constant 0 : i32
    %c0_i32_1 = arith.constant 0 : i32
    return %c0_i32, %c0_i32_0 : i32, i32
  }
  func.func @transform_3(%arg0: i32) -> (i32, i32) {
    %c0_i32 = arith.constant 0 : i32
    %c0_i32_0 = arith.constant 0 : i32
    %c0_i32_1 = arith.constant 0 : i32
    return %c0_i32, %c0_i32_0 : i32, i32
  }
  func.func @transform_4(%arg0: i32) -> (i32, i32) {
    %c0_i32 = arith.constant 0 : i32
    %c0_i32_0 = arith.constant 0 : i32
    %c0_i32_1 = arith.constant 0 : i32
    return %c0_i32, %c0_i32_0 : i32, i32
  }
  func.func @transform_5(%arg0: i32) -> (i32, i32) {
    %c0_i32 = arith.constant 0 : i32
    %c0_i32_0 = arith.constant 0 : i32
    %c0_i32_1 = arith.constant 0 : i32
    return %c0_i32, %c0_i32_0 : i32, i32
  }
  func.func @transform_6(%arg0: i32) -> (i32, i32) {
    %c0_i32 = arith.constant 0 : i32
    %c0_i32_0 = arith.constant 0 : i32
    %c0_i32_1 = arith.constant 0 : i32
    return %c0_i32, %c0_i32_0 : i32, i32
  }
  func.func @transform_7(%arg0: i32) -> (i32, i32) {
    %c0_i32 = arith.constant 0 : i32
    %c0_i32_0 = arith.constant 0 : i32
    return %c0_i32, %arg0 : i32, i32
  }
}

</mosaic_0001>

<bundles_post_ra>
// kernel: tpu_custom_call.1
= control target key start
LH: loop header
LB: loop body
LE: loop exit
PB: predicated region body
PF: predicated region fallthrough
CT: control target
= control target key end

     0   :  { %s1637_s0 = inlined_call_operand.hbm [shape: bf16[16,512], index: 0, kind: input, shape index: {}]   ;;  %s1638_s1 = inlined_call_operand.hbm [shape: bf16[512,256], index: 1, kind: input, shape index: {}]   ;;  %s1639_s2 = inlined_call_operand.vmem [shape: f32[1,256], index: 2, kind: input, shape index: {}]   ;;  %s1640_s3 = inlined_call_operand.hbm [shape: bf16[256,384], index: 3, kind: input, shape index: {}]   ;;  %s1641_s4 = inlined_call_operand.vmem [shape: f32[1,384], index: 4, kind: input, shape index: {}]   ;;  %s1642_s5 = inlined_call_operand.vmem [shape: f32[1,384], index: 5, kind: input, shape index: {}]   ;;  %s1643_s6 = inlined_call_operand.<no memory space> [shape: f32[1,1], index: 6, kind: input, shape index: {}]   ;;  %s1644_s7 = inlined_call_operand.hbm [shape: f32[1,16], index: 7, kind: output, shape index: {}]  }
   0x1   :  { %v12_v0 = vstv %s1643_s6 }
   0x2   :  { %13 = vst [vmem:[#allocation2] sm:$0x1] %v12_v0 }
   0x3   :  { %14 = vsyncpa [#allocation4], 0 }
   0x4   :  { %15 = vsyncpa [#allocation7], 0 }
   0x5   :  { %16 = vsyncpa [#allocation5], 0  ;;  %s1506_s26 = smov [#allocation6]   ;;  %s1412_s30 = scalar_lea.hbm %s1638_s1, 8192 }
   0x6   :  { %s34_s27 = sshll.u32 %s1506_s26, 4  ;;  %p1413_p0 = scmp.ne.s32.totalorder %s1638_s1, %s1412_s30  ;;  %s35_s27 = int_to_ptr.vmem [resolvable:$true] %s34_s27 }
   0x7   :  { %p1416_p1 = scmp.lt.u32.totalorder %s1412_s30, %s1638_s1 }
   0x9   :  { %p1418_p2 = pnand %p1416_p1, %p1413_p0 }
   0xb   :  { %1421 = shalt.err (!%p1418_p2)
}
   0xc   :  { %s1422_s6 = scalar_lea.vmem %s35_s27, 8192  ;;  %p1427_p4 = scmp.lt.s32.totalorder %s35_s27, %s35_s27 }
   0xd   :  { %p1423_p3 = scmp.ne.s32.totalorder %s35_s27, %s1422_s6  ;;  %p1428_p5 = scmp.lt.s32.totalorder %s1422_s6, %s1422_s6 }
   0xf   :  { %p1429_p6 = por %p1428_p5, %p1427_p4 }
  0x11   :  { %p1430_p7 = pnand %p1429_p6, %p1423_p3 }
  0x13   :  { %1433 = shalt.err (!%p1430_p7)
}
  0x14   :  { %s1507_s12 = smov 128   ;;  %s1508_s13 = smov 8  }
  0x15   :  { %40 = dma.hbm_to_vmem [thread:$0]  %s1638_s1, 8192, %s35_s27, [#allocation7], %s1507_s12, %s1507_s12, %s1508_s13  }
  0x16   :  { %s1509_s16 = smov [#allocation3]   ;;  %s1434_s20 = scalar_lea.hbm %s1637_s0, 512 }
  0x17   :  { %s22_s17 = sshll.u32 %s1509_s16, 4  ;;  %p1435_p8 = scmp.ne.s32.totalorder %s1637_s0, %s1434_s20  ;;  %s23_s17 = int_to_ptr.vmem [resolvable:$true] %s22_s17 }
  0x18   :  { %p1438_p9 = scmp.lt.u32.totalorder %s1434_s20, %s1637_s0 }
  0x1a   :  { %p1440_p10 = pnand %p1438_p9, %p1435_p8 }
  0x1c   :  { %1443 = shalt.err (!%p1440_p10)
}
  0x1d   :  { %s1444_s25 = scalar_lea.vmem %s23_s17, 512  ;;  %p1449_p12 = scmp.lt.s32.totalorder %s23_s17, %s23_s17 }
  0x1e   :  { %p1445_p11 = scmp.ne.s32.totalorder %s23_s17, %s1444_s25  ;;  %p1450_p13 = scmp.lt.s32.totalorder %s1444_s25, %s1444_s25 }
  0x20   :  { %p1451_p0 = por %p1450_p13, %p1449_p12 }
  0x22   :  { %p1452_p1 = pnand %p1451_p0, %p1445_p11 }
  0x24   :  { %1455 = shalt.err (!%p1452_p1)
}
  0x25   :  { %s1510_s1 = smov 256   ;;  %s1511_s26 = smov 16  }
  0x26   :  { %28 = dma.hbm_to_vmem [thread:$0]  %s1637_s0, 512, %s23_s17, [#allocation4], %s1510_s1, %s1510_s1, %s1511_s26  }
  0x27   :  { %s1512_s29 = smov [#allocation8]   ;;  %s1456_s10 = scalar_lea.hbm %s1640_s3, 6144 }
  0x28   :  { %s48_s30 = sshll.u32 %s1512_s29, 4  ;;  %p1457_p2 = scmp.ne.s32.totalorder %s1640_s3, %s1456_s10  ;;  %s49_s30 = int_to_ptr.vmem [resolvable:$true] %s48_s30 }
  0x29   :  { %p1460_p3 = scmp.lt.u32.totalorder %s1456_s10, %s1640_s3 }
  0x2b   :  { %p1462_p4 = pnand %p1460_p3, %p1457_p2 }
  0x2d   :  { %1465 = shalt.err (!%p1462_p4)
}
  0x2e   :  { %s1466_s14 = scalar_lea.vmem %s49_s30, 6144  ;;  %p1471_p6 = scmp.lt.s32.totalorder %s49_s30, %s49_s30 }
  0x2f   :  { %p1467_p5 = scmp.ne.s32.totalorder %s49_s30, %s1466_s14  ;;  %p1472_p7 = scmp.lt.s32.totalorder %s1466_s14, %s1466_s14 }
  0x31   :  { %p1473_p8 = por %p1472_p7, %p1471_p6 }
  0x33   :  { %p1474_p9 = pnand %p1473_p8, %p1467_p5 }
  0x35   :  { %1477 = shalt.err (!%p1474_p9)
}
  0x36   :  { %s1513_s0 = smov 192   ;;  %s1514_s15 = smov 12  }
  0x37   :  { %54 = dma.hbm_to_vmem [thread:$0]  %s1640_s3, 6144, %s49_s30, [#allocation7], %s1513_s0, %s1513_s0, %s1514_s15  }
  0x38   :  { %1500 = dma.done.wait [#allocation4], 512  }
  0x39   :  { %1501 = vsyncadd [#allocation4], 4294966784 }
  0x3a   :  { %1502 = dma.done.wait [#allocation7], 14336  }
  0x3b   :  { %1503 = vsyncadd [#allocation7], 4294952960  ;;  %v1246_v1 = vld [vmem:[#allocation6 + $0x4] ss:$8 sps:$4 sm:$0xff]   ;;  %v1248_v2 = vld [vmem:[#allocation6] ss:$8 sps:$4 sm:$0xff]  }
  0x3c   :  { %491 = vmatprep.subr.bf16.mxu0 %v1246_v1  ;;  %v1249_v3 = vld [vmem:[#allocation6 + $0x14] ss:$8 sps:$4 sm:$0xff]   ;;  %v1251_v4 = vld [vmem:[#allocation6 + $0x10] ss:$8 sps:$4 sm:$0xff]   ;;  %v1252_v5 = vld [vmem:[#allocation6 + $0x24] ss:$8 sps:$4 sm:$0xff]  }
  0x3d   :  { %492 = vmatpush1.bf16.msra.mxu0 %v1248_v2  ;;  %v1254_v6 = vld [vmem:[#allocation6 + $0x20] ss:$8 sps:$4 sm:$0xff]   ;;  %v1255_v7 = vld [vmem:[#allocation6 + $0x34] ss:$8 sps:$4 sm:$0xff]   ;;  %v1257_v8 = vld [vmem:[#allocation6 + $0x30] ss:$8 sps:$4 sm:$0xff]  }
  0x3e   :  { %493 = vmatprep.subr.bf16.mxu0 %v1249_v3  ;;  %v1258_v9 = vld [vmem:[#allocation6 + $0x44] ss:$8 sps:$4 sm:$0xff]   ;;  %v1260_v10 = vld [vmem:[#allocation6 + $0x40] ss:$8 sps:$4 sm:$0xff]   ;;  %v1261_v11 = vld [vmem:[#allocation6 + $0x54] ss:$8 sps:$4 sm:$0xff]  }
  0x3f   :  { %v1263_v12 = vld [vmem:[#allocation6 + $0x50] ss:$8 sps:$4 sm:$0xff]   ;;  %v1264_v13 = vld [vmem:[#allocation6 + $0x64] ss:$8 sps:$4 sm:$0xff]   ;;  %v1266_v15 = vld [vmem:[#allocation6 + $0x60] ss:$8 sps:$4 sm:$0xff]  }
  0x40   :  { %v1296_v14 = vld [vmem:[#allocation3 + $0x4] ss:$16 sps:$4 sm:$0xff]   ;;  %v1269_v17 = vld [vmem:[#allocation6 + $0x70] ss:$8 sps:$4 sm:$0xff]   ;;  %v1272_v19 = vld [vmem:[#allocation6 + $0x80] ss:$8 sps:$4 sm:$0xff]  }
  0x41   :  { %494 = vmatpush1.bf16.msra.mxu0 %v1251_v4  ;;  %v1267_v16 = vld [vmem:[#allocation6 + $0x74] ss:$8 sps:$4 sm:$0xff]   ;;  %523 = vmatprep.mubr.bf16.mxu0 %v1296_v14  ;;  %v1270_v18 = vld [vmem:[#allocation6 + $0x84] ss:$8 sps:$4 sm:$0xff]   ;;  %v1275_v21 = vld [vmem:[#allocation6 + $0x90] ss:$8 sps:$4 sm:$0xff]  }
  0x42   :  { %495 = vmatprep.subr.bf16.mxu0 %v1252_v5  ;;  %v1273_v20 = vld [vmem:[#allocation6 + $0x94] ss:$8 sps:$4 sm:$0xff]   ;;  %v1276_v22 = vld [vmem:[#allocation6 + $0xa4] ss:$8 sps:$4 sm:$0xff]   ;;  %v1278_v23 = vld [vmem:[#allocation6 + $0xa0] ss:$8 sps:$4 sm:$0xff]  }
  0x43   :  { %v1279_v24 = vld [vmem:[#allocation6 + $0xb4] ss:$8 sps:$4 sm:$0xff]   ;;  %v1281_v25 = vld [vmem:[#allocation6 + $0xb0] ss:$8 sps:$4 sm:$0xff]   ;;  %v1282_v26 = vld [vmem:[#allocation6 + $0xc4] ss:$8 sps:$4 sm:$0xff]  }
  0x44   :  { %v1348_v27 = vld [vmem:[#allocation8 + $0x4] ss:$12 sps:$4 sm:$0xff]   ;;  %v1350_v28 = vld [vmem:[#allocation8] ss:$12 sps:$4 sm:$0xff]   ;;  %v1351_v30 = vld [vmem:[#allocation8 + $0x1c] ss:$12 sps:$4 sm:$0xff]  }
  0x45   :  { %496 = vmatpush1.bf16.msra.mxu0 %v1254_v6  ;;  %v1284_v29 = vld [vmem:[#allocation6 + $0xc0] ss:$8 sps:$4 sm:$0xff]   ;;  %v1285_v31 = vld [vmem:[#allocation6 + $0xd4] ss:$8 sps:$4 sm:$0xff]   ;;  %920 = vmatprep.subr.bf16.mxu1 %v1348_v27  ;;  %v1353_v32 = vld [vmem:[#allocation8 + $0x18] ss:$12 sps:$4 sm:$0xff]  }
  0x46   :  { %497 = vmatprep.subr.bf16.mxu0 %v1255_v7  ;;  %921 = vmatpush1.bf16.msra.mxu1 %v1350_v28  ;;  %v1354_v33 = vld [vmem:[#allocation8 + $0x34] ss:$12 sps:$4 sm:$0xff]   ;;  %v1287_v34 = vld [vmem:[#allocation6 + $0xd0] ss:$8 sps:$4 sm:$0xff]   ;;  %v1288_v35 = vld [vmem:[#allocation6 + $0xe4] ss:$8 sps:$4 sm:$0xff]  }
  0x47   :  { %922 = vmatprep.subr.bf16.mxu1 %v1351_v30  ;;  %v1356_v36 = vld [vmem:[#allocation8 + $0x30] ss:$12 sps:$4 sm:$0xff]   ;;  %v1357_v37 = vld [vmem:[#allocation8 + $0x4c] ss:$12 sps:$4 sm:$0xff]   ;;  %v1290_v38 = vld [vmem:[#allocation6 + $0xe0] ss:$8 sps:$4 sm:$0xff]  }
  0x48   :  { %v1291_v39 = vld [vmem:[#allocation6 + $0xf4] ss:$8 sps:$4 sm:$0xff]   ;;  %v1360_v41 = vld [vmem:[#allocation8 + $0x64] ss:$12 sps:$4 sm:$0xff]   ;;  %v1297_v45 = vld [vmem:[#allocation6 + $0x100] ss:$8 sps:$4 sm:$0xff]  }
  0x49   :  { %498 = vmatpush1.bf16.msra.mxu0 %v1257_v8  ;;  %v1359_v40 = vld [vmem:[#allocation8 + $0x48] ss:$12 sps:$4 sm:$0xff]   ;;  %v1293_v42 = vld [vmem:[#allocation6 + $0xf0] ss:$8 sps:$4 sm:$0xff]   ;;  %v1299_v44 = vld [vmem:[#allocation6 + $0x104] ss:$8 sps:$4 sm:$0xff]  }
  0x4a   :  { %499 = vmatprep.subr.bf16.mxu0 %v1258_v9  ;;  %923 = vmatpush1.bf16.msra.mxu1 %v1353_v32  ;;  %v1294_v43 = vld [vmem:[#allocation3] ss:$16 sps:$4 sm:$0xff]   ;;  %v1302_v47 = vld [vmem:[#allocation6 + $0x114] ss:$8 sps:$4 sm:$0xff]   ;;  %v1365_v50 = vld [vmem:[#allocation8 + $0x78] ss:$12 sps:$4 sm:$0xff]  }
  0x4b   :  { %924 = vmatprep.subr.bf16.mxu1 %v1354_v33  ;;  %v1362_v46 = vld [vmem:[#allocation8 + $0x60] ss:$12 sps:$4 sm:$0xff]   ;;  %v1363_v48 = vld [vmem:[#allocation8 + $0x7c] ss:$12 sps:$4 sm:$0xff]   ;;  %v1300_v52 = vld [vmem:[#allocation6 + $0x110] ss:$8 sps:$4 sm:$0xff]  }
  0x4c   :  { %v1347_v49 = vld [vmem:[#allocation3 + $0xc] ss:$16 sps:$4 sm:$0xff]   ;;  %v1366_v51 = vld [vmem:[#allocation8 + $0x94] ss:$12 sps:$4 sm:$0xff]   ;;  %v1372_v59 = vld [vmem:[#allocation8 + $0xc4] ss:$12 sps:$4 sm:$0xff]  }
  0x4d   :  { %500 = vmatpush1.bf16.msra.mxu0 %v1260_v10  ;;  %v1305_v53 = vld [vmem:[#allocation6 + $0x124] ss:$8 sps:$4 sm:$0xff]   ;;  %v1368_v54 = vld [vmem:[#allocation8 + $0x90] ss:$12 sps:$4 sm:$0xff]   ;;  %v1303_v56 = vld [vmem:[#allocation6 + $0x120] ss:$8 sps:$4 sm:$0xff]  }
  0x4e   :  { %501 = vmatprep.subr.bf16.mxu0 %v1261_v11  ;;  %925 = vmatpush1.bf16.msra.mxu1 %v1356_v36  ;;  %v1369_v55 = vld [vmem:[#allocation8 + $0xac] ss:$12 sps:$4 sm:$0xff]   ;;  %v1308_v57 = vld [vmem:[#allocation6 + $0x134] ss:$8 sps:$4 sm:$0xff]   ;;  %v1309_v0 = vld [vmem:[#allocation6 + $0x140] ss:$8 sps:$4 sm:$0xff]  }
  0x4f   :  { %926 = vmatprep.subr.bf16.mxu1 %v1357_v37  ;;  %v1371_v58 = vld [vmem:[#allocation8 + $0xa8] ss:$12 sps:$4 sm:$0xff]   ;;  %v1306_v60 = vld [vmem:[#allocation6 + $0x130] ss:$8 sps:$4 sm:$0xff]   ;;  %v1311_v61 = vld [vmem:[#allocation6 + $0x144] ss:$8 sps:$4 sm:$0xff]  }
  0x50   :  { %v1374_v62 = vld [vmem:[#allocation8 + $0xc0] ss:$12 sps:$4 sm:$0xff]   ;;  %v1375_v63 = vld [vmem:[#allocation8 + $0xdc] ss:$12 sps:$4 sm:$0xff]   ;;  %v1377_v2 = vld [vmem:[#allocation8 + $0xd8] ss:$12 sps:$4 sm:$0xff]  }
  0x51   :  { %502 = vmatpush1.bf16.msra.mxu0 %v1263_v12  ;;  %v1314_v1 = vld [vmem:[#allocation6 + $0x154] ss:$8 sps:$4 sm:$0xff]   ;;  %v1312_v4 = vld [vmem:[#allocation6 + $0x150] ss:$8 sps:$4 sm:$0xff]   ;;  %v1317_v5 = vld [vmem:[#allocation6 + $0x164] ss:$8 sps:$4 sm:$0xff]  }
  0x52   :  { %503 = vmatprep.subr.bf16.mxu0 %v1264_v13  ;;  %927 = vmatpush1.bf16.msra.mxu1 %v1359_v40  ;;  %v1378_v3 = vld [vmem:[#allocation8 + $0xf4] ss:$12 sps:$4 sm:$0xff]   ;;  %v1380_v6 = vld [vmem:[#allocation8 + $0xf0] ss:$12 sps:$4 sm:$0xff]   ;;  %v1381_v7 = vld [vmem:[#allocation8 + $0x10c] ss:$12 sps:$4 sm:$0xff]  }
  0x53   :  { %928 = vmatprep.subr.bf16.mxu1 %v1360_v41  ;;  %v1315_v8 = vld [vmem:[#allocation6 + $0x160] ss:$8 sps:$4 sm:$0xff]   ;;  %v1320_v9 = vld [vmem:[#allocation6 + $0x174] ss:$8 sps:$4 sm:$0xff]   ;;  %v1384_v11 = vld [vmem:[#allocation8 + $0x124] ss:$12 sps:$4 sm:$0xff]  }
  0x54   :  { %v1383_v10 = vld [vmem:[#allocation8 + $0x108] ss:$12 sps:$4 sm:$0xff]   ;;  %v1318_v12 = vld [vmem:[#allocation6 + $0x170] ss:$8 sps:$4 sm:$0xff]   ;;  %v1323_v13 = vld [vmem:[#allocation6 + $0x184] ss:$8 sps:$4 sm:$0xff]  }
  0x55   :  { %504 = vmatpush1.bf16.msra.mxu0 %v1266_v15  ;;  %v1386_v14 = vld [vmem:[#allocation8 + $0x120] ss:$12 sps:$4 sm:$0xff]   ;;  %v1387_v15 = vld [vmem:[#allocation8 + $0x13c] ss:$12 sps:$4 sm:$0xff]   ;;  %v1336_v27 = vld [vmem:[#allocation6 + $0x1d0] ss:$8 sps:$4 sm:$0xff]  }
  0x56   :  { %505 = vmatprep.subr.bf16.mxu0 %v1267_v16  ;;  %929 = vmatpush1.bf16.msra.mxu1 %v1362_v46  ;;  %v1321_v16 = vld [vmem:[#allocation6 + $0x180] ss:$8 sps:$4 sm:$0xff]   ;;  %v1341_v28 = vld [vmem:[#allocation6 + $0x1e4] ss:$8 sps:$4 sm:$0xff]   ;;  %v1344_v30 = vld [vmem:[#allocation6 + $0x1f4] ss:$8 sps:$4 sm:$0xff]  }
  0x57   :  { %930 = vmatprep.subr.bf16.mxu1 %v1363_v48  ;;  %v1345_v32 = vld [vmem:[#allocation3 + $0x8] ss:$16 sps:$4 sm:$0xff]   ;;  %v1390_v33 = vld [vmem:[#allocation8 + $0x154] ss:$12 sps:$4 sm:$0xff]   ;;  %vm1066_vm0 = vcmask 130112   ;;  %vm1069_vm1 = vcmask 122880  }
  0x58   :  { %v1395_v36 = vld [vmem:[#allocation8 + $0x168] ss:$12 sps:$4 sm:$0xff]   ;;  %v139_v41 = vld [vmem:[%s1639_s2] sm:$0x3] }
  0x59   :  { %506 = vmatpush1.bf16.msra.mxu0 %v1269_v17  ;;  %v1326_v17 = vld [vmem:[#allocation6 + $0x194] ss:$8 sps:$4 sm:$0xff]  }
  0x5a   :  { %507 = vmatprep.subr.bf16.mxu0 %v1270_v18  ;;  %931 = vmatpush1.bf16.msra.mxu1 %v1365_v50  ;;  %v1389_v18 = vld [vmem:[#allocation8 + $0x138] ss:$12 sps:$4 sm:$0xff]   ;;  %v1396_v37 = vld [vmem:[#allocation8 + $0xc8] ss:$12 sps:$4 sm:$0xff]  }
  0x5b   :  { %932 = vmatprep.subr.bf16.mxu1 %v1366_v51 }
  0x5d   :  { %508 = vmatpush1.bf16.msra.mxu0 %v1272_v19  ;;  %v1324_v19 = vld [vmem:[#allocation6 + $0x190] ss:$8 sps:$4 sm:$0xff]  }
  0x5e   :  { %509 = vmatprep.subr.bf16.mxu0 %v1273_v20  ;;  %933 = vmatpush1.bf16.msra.mxu1 %v1368_v54  ;;  %v1329_v20 = vld [vmem:[#allocation6 + $0x1a4] ss:$8 sps:$4 sm:$0xff]  }
  0x5f   :  { %934 = vmatprep.subr.bf16.mxu1 %v1369_v55 }
  0x61   :  { %510 = vmatpush1.bf16.msra.mxu0 %v1275_v21  ;;  %v1327_v21 = vld [vmem:[#allocation6 + $0x1a0] ss:$8 sps:$4 sm:$0xff]  }
  0x62   :  { %511 = vmatprep.subr.bf16.mxu0 %v1276_v22  ;;  %935 = vmatpush1.bf16.msra.mxu1 %v1371_v58  ;;  %v1332_v22 = vld [vmem:[#allocation6 + $0x1b4] ss:$8 sps:$4 sm:$0xff]  }
  0x63   :  { %936 = vmatprep.subr.bf16.mxu1 %v1372_v59  ;;  %v1397_v59 = vld [vmem:[#allocation8 + $0x8] ss:$12 sps:$4 sm:$0xff]  }
  0x65   :  { %512 = vmatpush1.bf16.msra.mxu0 %v1278_v23  ;;  %v1330_v23 = vld [vmem:[#allocation6 + $0x1b0] ss:$8 sps:$4 sm:$0xff]  }
  0x66   :  { %513 = vmatprep.subr.bf16.mxu0 %v1279_v24  ;;  %937 = vmatpush1.bf16.msra.mxu1 %v1374_v62  ;;  %v1335_v24 = vld [vmem:[#allocation6 + $0x1c4] ss:$8 sps:$4 sm:$0xff]  }
  0x67   :  { %938 = vmatprep.subr.bf16.mxu1 %v1375_v63  ;;  %v1400_v62 = vld [vmem:[#allocation8 + $0xf8] ss:$12 sps:$4 sm:$0xff]  }
  0x68   :  { %v1401_v63 = vld [vmem:[#allocation8 + $0x38] ss:$12 sps:$4 sm:$0xff]  }
  0x69   :  { %514 = vmatpush1.bf16.msra.mxu0 %v1281_v25  ;;  %v1333_v25 = vld [vmem:[#allocation6 + $0x1c0] ss:$8 sps:$4 sm:$0xff]  }
  0x6a   :  { %515 = vmatprep.subr.bf16.mxu0 %v1282_v26  ;;  %939 = vmatpush1.bf16.msra.mxu1 %v1377_v2  ;;  %v1338_v26 = vld [vmem:[#allocation6 + $0x1d4] ss:$8 sps:$4 sm:$0xff]  }
  0x6b   :  { %940 = vmatprep.subr.bf16.mxu1 %v1378_v3  ;;  %v1404_v2 = vld [vmem:[#allocation8 + $0x128] ss:$12 sps:$4 sm:$0xff]  }
  0x6c   :  { %v1405_v3 = vld [vmem:[#allocation8 + $0x68] ss:$12 sps:$4 sm:$0xff]  }
  0x6d   :  { %516 = vmatpush1.bf16.msra.mxu0 %v1284_v29  ;;  %v1339_v29 = vld [vmem:[#allocation6 + $0x1e0] ss:$8 sps:$4 sm:$0xff]  }
  0x6e   :  { %517 = vmatprep.subr.bf16.mxu0 %v1285_v31  ;;  %941 = vmatpush1.bf16.msra.mxu1 %v1380_v6  ;;  %v1342_v31 = vld [vmem:[#allocation6 + $0x1f0] ss:$8 sps:$4 sm:$0xff]  }
  0x6f   :  { %942 = vmatprep.subr.bf16.mxu1 %v1381_v7  ;;  %v1408_v6 = vld [vmem:[#allocation8 + $0x158] ss:$12 sps:$4 sm:$0xff]  }
  0x70   :  { %v1409_v7 = vld [vmem:[#allocation8 + $0x98] ss:$12 sps:$4 sm:$0xff]  }
  0x71   :  { %518 = vmatpush1.bf16.msra.mxu0 %v1287_v34  ;;  %v1392_v34 = vld [vmem:[#allocation8 + $0x150] ss:$12 sps:$4 sm:$0xff]  }
  0x72   :  { %519 = vmatprep.subr.bf16.mxu0 %v1288_v35  ;;  %943 = vmatpush1.bf16.msra.mxu1 %v1383_v10  ;;  %v1393_v35 = vld [vmem:[#allocation8 + $0x16c] ss:$12 sps:$4 sm:$0xff]   ;;  %v1041_v10 = vld [vmem:[#allocation2] sm:$0x1] }
  0x73   :  { %944 = vmatprep.subr.bf16.mxu1 %v1384_v11  ;;  %v1515_v11 = vmov 0  }
  0x74   :  { %1244 = vset.pattern.permute.xlu1 %v1515_v11  ;;  %1245 = vset.pattern.permute.xlu0 %v1515_v11 }
  0x75   :  { %520 = vmatpush1.bf16.msra.mxu0 %v1290_v38  ;;  %v141_v38 = vlaneseq  ;;  %1044 = vperm.xlu1 %1244, %v1041_v10  }
  0x76   :  { %521 = vmatprep.subr.bf16.mxu0 %v1291_v39  ;;  %945 = vmatpush1.bf16.msra.mxu1 %v1386_v14  ;;  %v1010_v14 = vld [vmem:[%s1642_s5] sm:$0x7] }
  0x77   :  { %946 = vmatprep.subr.bf16.mxu1 %v1387_v15  ;;  %v1597_v39 = vshrl.u32 %v141_v38, 7 }
  0x79   :  { %522 = vmatpush1.bf16.msra.mxu0 %v1293_v42  ;;  %v1600_v40 = vsub.s32 0, %v1597_v39  ;;  %v1606_v42 = vsub.s32 1, %v1597_v39 }
  0x7a   :  { %534 = vmatprep.subr.bf16.mxu0 %v1299_v44  ;;  %947 = vmatpush1.bf16.msra.mxu1 %v1389_v18 }
  0x7b   :  { %948 = vmatprep.subr.bf16.mxu1 %v1390_v33  ;;  %v148_v44 = vrot.slane %v139_v41, %v1606_v42  ;;  %v1015_v18 = vrot.slane %v1010_v14, %v1600_v40 }
  0x7c   :  { %524 = vmatmul.mubr.bf16.vlgmr.msra.gmra.mrb[0].mxu0 %v1294_v43  ;;  %v144_v43 = vrot.slane %v139_v41, %v1600_v40 }
  0x7d   :  { %535 = vmatpush1.bf16.msra.mxu0 %v1297_v45  ;;  %566 = vmatprep.mubr.bf16.mxu0 %v1347_v49 }
  0x7e   :  { %536 = vmatprep.subr.bf16.mxu0 %v1302_v47  ;;  %949 = vmatpush1.bf16.msra.mxu1 %v1392_v34 }
  0x7f   :  { %950 = vmatprep.subr.bf16.mxu1 %v1393_v35 }
  0x81   :  { %537 = vmatpush1.bf16.msra.mxu0 %v1300_v52 }
  0x82   :  { %538 = vmatprep.subr.bf16.mxu0 %v1305_v53  ;;  %951 = vmatpush1.bf16.msra.mxu1 %v1395_v36  ;;  %v659_v36 = vsub.s32 2, %v1597_v39 }
  0x83   :  { %1203 = vmatprep.subr.bf16.mxu1 %v1396_v37 }
  0x85   :  { %539 = vmatpush1.bf16.msra.mxu0 %v1303_v56 }
  0x86   :  { %540 = vmatprep.subr.bf16.mxu0 %v1308_v57 }
  0x89   :  { %541 = vmatpush1.bf16.msra.mxu0 %v1306_v60  ;;  %v1398_v60 = vld [vmem:[#allocation8 + $0xe0] ss:$12 sps:$4 sm:$0xff]  }
  0x8a   :  { %542 = vmatprep.subr.bf16.mxu0 %v1311_v61  ;;  %v1399_v61 = vld [vmem:[#allocation8 + $0x20] ss:$12 sps:$4 sm:$0xff]  }
  0x8d   :  { %543 = vmatpush1.bf16.msra.mxu0 %v1309_v0  ;;  %v1402_v0 = vld [vmem:[#allocation8 + $0x110] ss:$12 sps:$4 sm:$0xff]  }
  0x8e   :  { %544 = vmatprep.subr.bf16.mxu0 %v1314_v1  ;;  %v1403_v1 = vld [vmem:[#allocation8 + $0x50] ss:$12 sps:$4 sm:$0xff]  }
  0x91   :  { %545 = vmatpush1.bf16.msra.mxu0 %v1312_v4  ;;  %v1406_v4 = vld [vmem:[#allocation8 + $0x140] ss:$12 sps:$4 sm:$0xff]  }
  0x92   :  { %546 = vmatprep.subr.bf16.mxu0 %v1317_v5  ;;  %v1407_v5 = vld [vmem:[#allocation8 + $0x80] ss:$12 sps:$4 sm:$0xff]  }
  0x95   :  { %547 = vmatpush1.bf16.msra.mxu0 %v1315_v8  ;;  %v1410_v8 = vld [vmem:[#allocation8 + $0x170] ss:$12 sps:$4 sm:$0xff]  }
  0x96   :  { %548 = vmatprep.subr.bf16.mxu0 %v1320_v9  ;;  %v1411_v9 = vld [vmem:[#allocation8 + $0xb0] ss:$12 sps:$4 sm:$0xff]  }
  0x99   :  { %549 = vmatpush1.bf16.msra.mxu0 %v1318_v12  ;;  %v647_v12 = vld [vmem:[%s1641_s4] sm:$0x7]  ;;  %s1516_s4 = smov [#allocation9]  }
  0x9a   :  { %550 = vmatprep.subr.bf16.mxu0 %v1323_v13  ;;  %v652_v13 = vrot.slane %v647_v12, %v1600_v40  ;;  %v656_v15 = vrot.slane %v647_v12, %v1606_v42  ;;  %v660_v41 = vrot.slane %v647_v12, %v659_v36  ;;  %s1077_s5 = sshll.u32 %s1516_s4, 4  ;;  %s1078_s5 = int_to_ptr.vmem [resolvable:$true] %s1077_s5 }
  0x9b   :  { %s1478_s22 = scalar_lea.vmem %s1078_s5, 16  ;;  %s1482_s23 = scalar_lea.vmem %s1078_s5, 32 }
  0x9c   :  { %p1479_p10 = scmp.ne.s32.totalorder %s1078_s5, %s1478_s22  ;;  %p1483_p11 = scmp.lt.s32.totalorder %s1078_s5, %s1078_s5 }
  0x9d   :  { %551 = vmatpush1.bf16.msra.mxu0 %v1321_v16  ;;  %p1484_p12 = scmp.lt.s32.totalorder %s1482_s23, %s1478_s22 }
  0x9e   :  { %552 = vmatprep.subr.bf16.mxu0 %v1326_v17 }
  0x9f   :  { %p1485_p13 = por %p1484_p12, %p1483_p11 }
  0xa1   :  { %553 = vmatpush1.bf16.msra.mxu0 %v1324_v19  ;;  %p1486_p0 = pnand %p1485_p13, %p1479_p10 }
  0xa2   :  { %554 = vmatprep.subr.bf16.mxu0 %v1329_v20 }
  0xa5   :  { %555 = vmatpush1.bf16.msra.mxu0 %v1327_v21  ;;  %v1019_v21 = vrot.slane %v1010_v14, %v1606_v42 }
  0xa6   :  { %556 = vmatprep.subr.bf16.mxu0 %v1332_v22 }
  0xa9   :  { %557 = vmatpush1.bf16.msra.mxu0 %v1330_v23 }
  0xaa   :  { %558 = vmatprep.subr.bf16.mxu0 %v1335_v24 }
  0xad   :  { %559 = vmatpush1.bf16.msra.mxu0 %v1333_v25 }
  0xae   :  { %560 = vmatprep.subr.bf16.mxu0 %v1338_v26 }
  0xb1   :  { %561 = vmatpush1.bf16.msra.mxu0 %v1336_v27 }
  0xb2   :  { %562 = vmatprep.subr.bf16.mxu0 %v1341_v28 }
  0xb5   :  { %563 = vmatpush1.bf16.msra.mxu0 %v1339_v29 }
  0xb6   :  { %564 = vmatprep.subr.bf16.mxu0 %v1344_v30 }
  0xb9   :  { %565 = vmatpush1.bf16.msra.mxu0 %v1342_v31 }
  0xbc   :  { %567 = vmatmul.mubr.bf16.vlgmr.msra.gmra.mrb[0].mxu0 %v1345_v32 }
 0x18f   :  { %v568_v45 = vpop.f32.mrb[0].mxu0 }
 0x190   :  { %v1225_v46 = vadd.f32 %v568_v45, %v144_v43  ;;  %v570_v47 = vpop.f32.mrb[1].mxu0 }
 0x191   :  { %v1226_v48 = vadd.f32 %v570_v47, %v148_v44  ;;  %v572_v49 = vpop.f32.mrb[2].mxu0 }
 0x192   :  { %v1227_v50 = vadd.f32 %v572_v49, %v144_v43  ;;  %v574_v51 = vpop.f32.mrb[3].mxu0  ;;  %v577_v53 = vmax.f32 %v1225_v46, 0.0 }
 0x193   :  { %v1228_v52 = vadd.f32 %v574_v51, %v148_v44  ;;  %v578_v55 = vmax.f32 %v1226_v48, 0.0  ;;  %v1023_v48 = vrot.slane %v1010_v14, %v659_v36 }
 0x194   :  { %v579_v54 = vmax.f32 %v1227_v50, 0.0 }
 0x195   :  { %v580_v56 = vmax.f32 %v1228_v52, 0.0 }
 0x196   :  { %v581_v57 = vpack.c.bf16 %v579_v54, %v577_v53 }
 0x197   :  { %v582_v58 = vpack.c.bf16 %v580_v56, %v578_v55  ;;  %v1045_v56 = vpop.permute.xlu1 %1044 }
 0x199   :  { %952 = vmatprep.mubr.bf16.mxu1 %v582_v58 }
 0x19a   :  { %953 = vmatmul.mubr.bf16.vlgmr.msra.gmra.mrb[0].mxu1 %v581_v57 }
 0x19b   :  { %1204 = vmatpush3.bf16.msra.mxu1 %v1397_v59  ;;  %995 = vmatprep.mubr.bf16.mxu1 %v582_v58  ;;  %v1050_v58 = vrot.slane %v1045_v56, %v1600_v40 }
 0x19c   :  { %1205 = vmatprep.subr.bf16.mxu1 %v1398_v60 }
 0x19f   :  { %1206 = vmatpush3.bf16.msra.mxu1 %v1399_v61 }
 0x1a0   :  { %1207 = vmatprep.subr.bf16.mxu1 %v1400_v62 }
 0x1a3   :  { %1208 = vmatpush3.bf16.msra.mxu1 %v1401_v63 }
 0x1a4   :  { %1209 = vmatprep.subr.bf16.mxu1 %v1402_v0 }
 0x1a7   :  { %1210 = vmatpush3.bf16.msra.mxu1 %v1403_v1 }
 0x1a8   :  { %1211 = vmatprep.subr.bf16.mxu1 %v1404_v2 }
 0x1ab   :  { %1212 = vmatpush3.bf16.msra.mxu1 %v1405_v3 }
 0x1ac   :  { %1213 = vmatprep.subr.bf16.mxu1 %v1406_v4 }
 0x1af   :  { %1214 = vmatpush3.bf16.msra.mxu1 %v1407_v5 }
 0x1b0   :  { %1215 = vmatprep.subr.bf16.mxu1 %v1408_v6 }
 0x1b3   :  { %1216 = vmatpush3.bf16.msra.mxu1 %v1409_v7 }
 0x1b4   :  { %1217 = vmatprep.subr.bf16.mxu1 %v1410_v8 }
 0x1b7   :  { %1218 = vmatpush3.bf16.msra.mxu1 %v1411_v9 }
 0x1ba   :  { %996 = vmatmul.mubr.bf16.vlgmr.msra.gmra.mrb[4].mxu1 %v581_v57  ;;  %v1056_v57 = vand.u32 127, %v141_v38 }
 0x1bc   :  { %v1061_v59 = vadd.s32 4294967288, %v1056_v57  ;;  %v1059_v61 = vsub.s32 %v1056_v57, %v1597_v39 }
 0x1be   :  { %v1064_v63 = vsub.s32 %v1061_v59, %v1597_v39 }
 0x26d   :  { %v954_v16 = vpop.f32.mrb[0].mxu1 }
 0x26e   :  { %v955_v17 = vadd.f32 %v954_v16, %v652_v13  ;;  %v956_v19 = vpop.f32.mrb[1].mxu1 }
 0x26f   :  { %v957_v20 = vadd.f32 %v956_v19, %v656_v15  ;;  %v958_v22 = vpop.f32.mrb[2].mxu1 }
 0x270   :  { %v1004_v23 = vmax.f32 %v955_v17, 0.0  ;;  %v959_v24 = vadd.f32 %v958_v22, %v652_v13  ;;  %v960_v25 = vpop.f32.mrb[3].mxu1 }
 0x271   :  { %v1005_v26 = vmax.f32 %v957_v20, 0.0  ;;  %v961_v27 = vadd.f32 %v960_v25, %v656_v15 }
 0x272   :  { %v1027_v28 = vmul.f32 %v1015_v18, %v1004_v23  ;;  %v1007_v29 = vmax.f32 %v959_v24, 0.0 }
 0x273   :  { %v1028_v30 = vmul.f32 %v1019_v21, %v1005_v26  ;;  %v1008_v31 = vmax.f32 %v961_v27, 0.0 }
 0x274   :  { %v1030_v32 = vmul.f32 %v1015_v18, %v1007_v29 }
 0x275   :  { %v1031_v33 = vmul.f32 %v1019_v21, %v1008_v31  ;;  %v1033_v34 = vadd.f32 %v1028_v30, %v1027_v28 }
 0x277   :  { %v1037_v35 = vadd.f32 %v1031_v33, %v1030_v32 }
 0x28d   :  { %v1219_v37 = vpop.f32.mrb[4].mxu1 }
 0x28e   :  { %v1220_v43 = vpop.f32.mrb[5].mxu1 }
 0x28f   :  { %v1221_v42 = vadd.f32 %v1220_v43, %v1219_v37  ;;  %v1222_v44 = vpop.f32.mrb[6].mxu1 }
 0x290   :  { %v1223_v45 = vpop.f32.mrb[7].mxu1 }
 0x291   :  { %v998_v46 = vadd.f32 %v1221_v42, %v660_v41  ;;  %v1224_v47 = vadd.f32 %v1223_v45, %v1222_v44 }
 0x293   :  { %v1006_v49 = vmax.f32 %v998_v46, 0.0  ;;  %v1001_v50 = vadd.f32 %v1224_v47, %v660_v41 }
 0x295   :  { %v1009_v51 = vmax.f32 %v1001_v50, 0.0  ;;  %v1029_v52 = vmul.f32 %v1023_v48, %v1006_v49 }
 0x297   :  { %v1034_v53 = vadd.f32 %v1033_v34, %v1029_v52  ;;  %v1032_v54 = vmul.f32 %v1023_v48, %v1009_v51 }
 0x299   :  { %1035 = vadd.xlane.f32.xlu0 %v1034_v53  ;;  %v1038_v55 = vadd.f32 %v1037_v35, %v1032_v54 }
 0x29d   :  { %1039 = vadd.xlane.f32.xlu0 %v1038_v55 }
 0x326   :  { %v1036_v60 = vpop.xlane.xlu0 %1035 }
 0x327   :  { %v1051_v62 = vadd.f32 %v1050_v58, %v1036_v60 }
 0x329   :  { %v1060_v2 = vrot.slane %v1051_v62, %v1059_v61 }
 0x32a   :  { %v1040_v0 = vpop.xlane.xlu0 %1039 }
 0x32b   :  { %v1052_v1 = vadd.f32 %v1050_v58, %v1040_v0 }
 0x32d   :  { %v1065_v3 = vrot.slane %v1052_v1, %v1064_v63 }
 0x32f   :  { %v1067_v4 = vsel %vm1066_vm0, %v1065_v3, %v1060_v2 }
 0x330   :  { %1070 = vst.msk [vmem:[#allocation9] sm:$0x1] %vm1069_vm1, %v1067_v4 }
 0x331   :  { %1489 = shalt.err (!%p1486_p0)
}
 0x332   :  { %s1490_s1 = scalar_lea.hbm %s1644_s7, 16 }
 0x333   :  { %p1491_p1 = scmp.ne.s32.totalorder %s1644_s7, %s1490_s1  ;;  %p1494_p2 = scmp.lt.u32.totalorder %s1490_s1, %s1644_s7 }
 0x335   :  { %p1496_p3 = pnand %p1494_p2, %p1491_p1 }
 0x337   :  { %1499 = shalt.err (!%p1496_p3)
}
 0x338   :  { %1080 = dma.vmem_to_hbm [thread:$0]  %s1078_s5, 16, %s1644_s7, [#allocation5]  }
 0x339   :  { %1504 = dma.done.wait [#allocation5], 16  }
 0x33a   :  { %1505 = vsyncadd [#allocation5], 4294967280 }
 0x33b   :  { %1084 = vsyncpa [#allocation4], 1 }
 0x33c   :  { %1085 = vsyncpa [#allocation7], 1 }
 0x33d   :  { %1086 = vsyncpa [#allocation5], 1 }

</bundles_post_ra>
